<compile_context>
chip_gen: v7x
topology: tpu7x:2x2x1
jax: 0.10.0
libtpu: 0.0.40
codegen_flags: <defaults>
</compile_context>

<pallas_src>
import functools

import jax
import jax.numpy as jnp
import numpy as np
from jax.experimental import pallas as pl
from jax.experimental.pallas import tpu as pltpu


# ---------------------------------------------------------------------------
# Fused Pallas kernel: all GIN layers + mean pool + prediction head
# ---------------------------------------------------------------------------

def fused_gnn_kernel(h0_ref, a_ref, eagg_ref, w_ref, b_ref,
                     p_ref, pw_ref, pb_ref, o_ref, h_sc, *, num_layer):
    """h_{l+1} = act((h_l + A @ h_l + eagg_l) @ W_l + b_l);  out = (P @ h_L) @ Wp + bp.

    Shapes (all padded, lane-dense):
      h0_ref   (Np, Dp) f32      a_ref   (Np, Np) bf16
      eagg_ref (L, Np, Dp) f32   w_ref   (L, Dp, Dp) bf16   b_ref (L, 1, Dp) f32
      p_ref    (Gp, Np) bf16     pw_ref  (Dp, Tp) bf16      pb_ref (1, Tp) f32
      o_ref    (Gp, Tp) f32      h_sc    (Np, Dp) f32 VMEM scratch
    """
    h_sc[...] = h0_ref[...]
    a = a_ref[...]                                   # adjacency resident across layers

    # num_layer is a trace-time constant: the layer loop unrolls inside this single
    # kernel body; h stays resident in VMEM scratch the whole time.
    for l in range(num_layer):
        h = h_sc[...]
        agg = (h
               + jnp.dot(a, h.astype(jnp.bfloat16),
                         preferred_element_type=jnp.float32)
               + eagg_ref[l])
        out = (jnp.dot(agg.astype(jnp.bfloat16), w_ref[l],
                       preferred_element_type=jnp.float32)
               + b_ref[l])
        if l != num_layer - 1:                       # JK='last': no ReLU on final layer
            out = jnp.maximum(out, 0.0)
        h_sc[...] = out

    # global_mean_pool + graph_pred_linear, fused while h is still in VMEM.
    graph_rep = jnp.dot(p_ref[...], h_sc[...].astype(jnp.bfloat16),
                        preferred_element_type=jnp.float32)
    o_ref[...] = (jnp.dot(graph_rep.astype(jnp.bfloat16), pw_ref[...],
                          preferred_element_type=jnp.float32)
                  + pb_ref[...])


# ---------------------------------------------------------------------------
# Model (parameters + forward)
# ---------------------------------------------------------------------------

NUM_ATOM_TYPE = 120
NUM_CHIRALITY = 3
NUM_BOND_TYPE = 6
NUM_BOND_DIR = 3


def _round_up(x, m):
    return (x + m - 1) // m * m


def init_params(key, num_layer, emb_dim, num_tasks):
    if num_layer < 2:
        raise ValueError("Number of GNN layers must be greater than 1.")
    keys = jax.random.split(key, 6 + 4 * num_layer)
    p = {
        "atom_emb1": 0.1 * jax.random.normal(keys[0], (NUM_ATOM_TYPE, emb_dim), jnp.float32),
        "atom_emb2": 0.1 * jax.random.normal(keys[1], (NUM_CHIRALITY, emb_dim), jnp.float32),
        "pred_w": 0.1 * jax.random.normal(keys[2], (emb_dim, num_tasks), jnp.float32),
        "pred_b": 0.1 * jax.random.normal(keys[3], (1, num_tasks), jnp.float32),
        "layers": [],
    }
    for l in range(num_layer):
        kk = keys[4 + 4 * l: 8 + 4 * l]
        p["layers"].append({
            "edge_emb1": 0.1 * jax.random.normal(kk[0], (NUM_BOND_TYPE, emb_dim), jnp.float32),
            "edge_emb2": 0.1 * jax.random.normal(kk[1], (NUM_BOND_DIR, emb_dim), jnp.float32),
            "w": 0.1 * jax.random.normal(kk[2], (emb_dim, emb_dim), jnp.float32),
            "b": 0.1 * jax.random.normal(kk[3], (1, emb_dim), jnp.float32),
        })
    return p


def gnn_graphpred_forward(params, x, edge_index, edge_attr, batch, num_graphs):
    """Equivalent of GNN_graphpred.forward with graph_pooling='mean', JK='last'."""
    n = x.shape[0]
    d = params["atom_emb1"].shape[1]
    t = params["pred_w"].shape[1]
    num_layer = len(params["layers"])

    # ---- plain-JAX glue: embedding gathers + scatter-add aggregations -------
    h0 = params["atom_emb1"][x[:, 0]] + params["atom_emb2"][x[:, 1]]      # (N, D)
    src, dst = edge_index[0], edge_index[1]
    adj = jnp.zeros((n, n), jnp.float32).at[dst, src].add(1.0)            # (N, N)

    eaggs = []
    for lp in params["layers"]:
        edge_emb = lp["edge_emb1"][edge_attr[:, 0]] + lp["edge_emb2"][edge_attr[:, 1]]
        eaggs.append(jnp.zeros((n, d), jnp.float32).at[dst].add(edge_emb))
    eagg = jnp.stack(eaggs, axis=0)                                        # (L, N, D)
    w_stack = jnp.stack([lp["w"] for lp in params["layers"]], axis=0)      # (L, D, D)
    b_stack = jnp.stack([lp["b"] for lp in params["layers"]], axis=0)      # (L, 1, D)

    onehot = (batch[None, :] == jnp.arange(num_graphs)[:, None]).astype(jnp.float32)
    counts = jnp.maximum(onehot.sum(axis=1, keepdims=True), 1.0)
    pool_mat = onehot / counts                                             # (G, N)

    # ---- pad to lane-dense (multiple of 128) slabs; bf16 for MXU operands ---
    n_pad = max(_round_up(n, 128), 128)
    d_pad = max(_round_up(d, 128), 128)
    t_pad = max(_round_up(t, 128), 128)
    g_pad = max(_round_up(num_graphs, 8), 8)

    h0_p = jnp.pad(h0, ((0, n_pad - n), (0, d_pad - d)))
    adj_p = jnp.pad(adj, ((0, n_pad - n), (0, n_pad - n))).astype(jnp.bfloat16)
    eagg_p = jnp.pad(eagg, ((0, 0), (0, n_pad - n), (0, d_pad - d)))
    w_p = jnp.pad(w_stack, ((0, 0), (0, d_pad - d), (0, d_pad - d))).astype(jnp.bfloat16)
    b_p = jnp.pad(b_stack, ((0, 0), (0, 0), (0, d_pad - d)))
    p_p = jnp.pad(pool_mat, ((0, g_pad - num_graphs), (0, n_pad - n))).astype(jnp.bfloat16)
    pw_p = jnp.pad(params["pred_w"], ((0, d_pad - d), (0, t_pad - t))).astype(jnp.bfloat16)
    pb_p = jnp.pad(params["pred_b"], ((0, 0), (0, t_pad - t)))

    vmem = pl.BlockSpec(memory_space=pltpu.MemorySpace.VMEM)
    out_p = pl.pallas_call(
        functools.partial(fused_gnn_kernel, num_layer=num_layer),
        out_shape=jax.ShapeDtypeStruct((g_pad, t_pad), jnp.float32),
        in_specs=[vmem] * 8,
        out_specs=vmem,
        scratch_shapes=[pltpu.VMEM((n_pad, d_pad), jnp.float32)],
        compiler_params=pltpu.CompilerParams(vmem_limit_bytes=32 * 1024 * 1024),
    )(h0_p, adj_p, eagg_p, w_p, b_p, p_p, pw_p, pb_p)

    return out_p[:num_graphs, :t]


def reference_forward(params, x, edge_index, edge_attr, batch, num_graphs):
    """Pure-JAX f32 reference for numerical check."""
    n = x.shape[0]
    h = params["atom_emb1"][x[:, 0]] + params["atom_emb2"][x[:, 1]]
    src, dst = edge_index[0], edge_index[1]
    adj = jnp.zeros((n, n), jnp.float32).at[dst, src].add(1.0)
    num_layer = len(params["layers"])
    for l in range(num_layer):
        lp = params["layers"][l]
        edge_emb = lp["edge_emb1"][edge_attr[:, 0]] + lp["edge_emb2"][edge_attr[:, 1]]
        edge_agg = jnp.zeros((n, h.shape[1]), jnp.float32).at[dst].add(edge_emb)
        out = (h + adj @ h + edge_agg) @ lp["w"] + lp["b"]
        h = jnp.maximum(out, 0.0) if l != num_layer - 1 else out
    onehot = (batch[None, :] == jnp.arange(num_graphs)[:, None]).astype(jnp.float32)
    counts = jnp.maximum(onehot.sum(axis=1, keepdims=True), 1.0)
    graph_rep = (onehot / counts) @ h
    return graph_rep @ params["pred_w"] + params["pred_b"]


# ---------------------------------------------------------------------------
# Main
# ---------------------------------------------------------------------------

if __name__ == "__main__":
    NUM_LAYER = 2          # args.num_layer (must be >= 2)
    EMB_DIM = 32           # args.emb_dim
    NUM_TASKS = 8
    N_NODES = 32
    N_EDGES = 64
    N_GRAPHS = 4

    key = jax.random.PRNGKey(0)
    k_param, k_x1, k_x2, k_e, k_a1, k_a2 = jax.random.split(key, 6)

    params = init_params(k_param, NUM_LAYER, EMB_DIM, NUM_TASKS)

    x = jnp.stack(
        [
            jax.random.randint(k_x1, (N_NODES,), 0, NUM_ATOM_TYPE),
            jax.random.randint(k_x2, (N_NODES,), 0, NUM_CHIRALITY),
        ],
        axis=1,
    ).astype(jnp.int32)                                               # (N, 2)

    edge_index = jax.random.randint(k_e, (2, N_EDGES), 0, N_NODES).astype(jnp.int32)
    edge_attr = jnp.stack(
        [
            jax.random.randint(k_a1, (N_EDGES,), 0, NUM_BOND_TYPE),
            jax.random.randint(k_a2, (N_EDGES,), 0, NUM_BOND_DIR),
        ],
        axis=1,
    ).astype(jnp.int32)                                               # (E, 2)

    batch = jnp.repeat(jnp.arange(N_GRAPHS, dtype=jnp.int32), N_NODES // N_GRAPHS)  # (N,)

    out = gnn_graphpred_forward(params, x, edge_index, edge_attr, batch, N_GRAPHS)
    out = jax.block_until_ready(out)

    ref = reference_forward(params, x, edge_index, edge_attr, batch, N_GRAPHS)
    ref = jax.block_until_ready(ref)
    np.testing.assert_allclose(np.asarray(out), np.asarray(ref), rtol=1e-2, atol=1e-2)

    assert out.shape == (N_GRAPHS, NUM_TASKS)
    print("KERNEL_OK")
</pallas_src>

<mosaic_0001>
module attributes {stable_mosaic.version = 11 : i64} {
  func.func @fused_gnn_kernel(%arg0: memref<128x128xf32, #tpu.memory_space<vmem>>, %arg1: memref<128x128xbf16, #tpu.memory_space<vmem>>, %arg2: memref<2x128x128xf32, #tpu.memory_space<vmem>>, %arg3: memref<2x128x128xbf16, #tpu.memory_space<vmem>>, %arg4: memref<2x1x128xf32, #tpu.memory_space<vmem>>, %arg5: memref<8x128xbf16, #tpu.memory_space<vmem>>, %arg6: memref<128x128xbf16, #tpu.memory_space<vmem>>, %arg7: memref<1x128xf32, #tpu.memory_space<vmem>>, %arg8: memref<8x128xf32, #tpu.memory_space<vmem>>, %arg9: memref<128x128xf32, #tpu.memory_space<vmem>>) attributes {dimension_semantics = [], scalar_prefetch = 0 : i64, scratch_operands = 1 : i64, tpu.core_type = #tpu.core_type<tc>} {
    %c0 = arith.constant 0 : index
    %c0_0 = arith.constant 0 : index
    %0 = vector.load %arg0[%c0, %c0_0] : memref<128x128xf32, #tpu.memory_space<vmem>>, vector<128x128xf32>
    %c0_1 = arith.constant 0 : index
    %c0_2 = arith.constant 0 : index
    %1 = vector.load %arg9[%c0_1, %c0_2] : memref<128x128xf32, #tpu.memory_space<vmem>>, vector<128x128xf32>
    tpu.vector_store %arg9[%c0_1, %c0_2], %0 {strides = array<i32>} : memref<128x128xf32, #tpu.memory_space<vmem>>, vector<128x128xf32>,
    %c0_3 = arith.constant 0 : index
    %c0_4 = arith.constant 0 : index
    %2 = vector.load %arg1[%c0_3, %c0_4] : memref<128x128xbf16, #tpu.memory_space<vmem>>, vector<128x128xbf16>
    %c0_5 = arith.constant 0 : index
    %c0_6 = arith.constant 0 : index
    %3 = vector.load %arg9[%c0_5, %c0_6] : memref<128x128xf32, #tpu.memory_space<vmem>>, vector<128x128xf32>
    %4 = arith.truncf %3 : vector<128x128xf32> to vector<128x128xbf16>
    %cst = arith.constant dense<0.000000e+00> : vector<128x128xf32>
    %5 = tpu.matmul %2, %4, %cst {dimension_numbers = #tpu.dot_dimension_numbers<[1], [0], [0], [1], [0, 0, 1, 1], [], []>} : vector<128x128xbf16>, vector<128x128xbf16>, vector<128x128xf32> -> vector<128x128xf32>
    %6 = arith.addf %3, %5 : vector<128x128xf32>
    %c0_7 = arith.constant 0 : index
    %c0_8 = arith.constant 0 : index
    %c0_9 = arith.constant 0 : index
    %7 = vector.load %arg2[%c0_7, %c0_8, %c0_9] : memref<2x128x128xf32, #tpu.memory_space<vmem>>, vector<1x128x128xf32>
    %8 = vector.shape_cast %7 : vector<1x128x128xf32> to vector<128x128xf32>
    %9 = arith.addf %6, %8 : vector<128x128xf32>
    %10 = arith.truncf %9 : vector<128x128xf32> to vector<128x128xbf16>
    %c0_10 = arith.constant 0 : index
    %c0_11 = arith.constant 0 : index
    %c0_12 = arith.constant 0 : index
    %11 = vector.load %arg3[%c0_10, %c0_11, %c0_12] : memref<2x128x128xbf16, #tpu.memory_space<vmem>>, vector<1x128x128xbf16>
    %12 = vector.shape_cast %11 : vector<1x128x128xbf16> to vector<128x128xbf16>
    %cst_13 = arith.constant dense<0.000000e+00> : vector<128x128xf32>
    %13 = tpu.matmul %10, %12, %cst_13 {dimension_numbers = #tpu.dot_dimension_numbers<[1], [0], [0], [1], [0, 0, 1, 1], [], []>} : vector<128x128xbf16>, vector<128x128xbf16>, vector<128x128xf32> -> vector<128x128xf32>
    %c0_14 = arith.constant 0 : index
    %c0_15 = arith.constant 0 : index
    %c0_16 = arith.constant 0 : index
    %14 = vector.load %arg4[%c0_14, %c0_15, %c0_16] : memref<2x1x128xf32, #tpu.memory_space<vmem>>, vector<1x1x128xf32>
    %15 = vector.shape_cast %14 : vector<1x1x128xf32> to vector<1x128xf32>
    %16 = vector.broadcast %15 : vector<1x128xf32> to vector<128x128xf32>
    %17 = arith.addf %13, %16 : vector<128x128xf32>
    %cst_17 = arith.constant 0.000000e+00 : f32
    %18 = vector.broadcast %cst_17 : f32 to vector<128x128xf32>
    %19 = arith.maximumf %17, %18 : vector<128x128xf32>
    %c0_18 = arith.constant 0 : index
    %c0_19 = arith.constant 0 : index
    %20 = vector.load %arg9[%c0_18, %c0_19] : memref<128x128xf32, #tpu.memory_space<vmem>>, vector<128x128xf32>
    tpu.vector_store %arg9[%c0_18, %c0_19], %19 {strides = array<i32>} : memref<128x128xf32, #tpu.memory_space<vmem>>, vector<128x128xf32>,
    %c0_20 = arith.constant 0 : index
    %c0_21 = arith.constant 0 : index
    %21 = vector.load %arg9[%c0_20, %c0_21] : memref<128x128xf32, #tpu.memory_space<vmem>>, vector<128x128xf32>
    %22 = arith.truncf %21 : vector<128x128xf32> to vector<128x128xbf16>
    %cst_22 = arith.constant dense<0.000000e+00> : vector<128x128xf32>
    %23 = tpu.matmul %2, %22, %cst_22 {dimension_numbers = #tpu.dot_dimension_numbers<[1], [0], [0], [1], [0, 0, 1, 1], [], []>} : vector<128x128xbf16>, vector<128x128xbf16>, vector<128x128xf32> -> vector<128x128xf32>
    %24 = arith.addf %21, %23 : vector<128x128xf32>
    %c1 = arith.constant 1 : index
    %c0_23 = arith.constant 0 : index
    %c0_24 = arith.constant 0 : index
    %25 = vector.load %arg2[%c1, %c0_23, %c0_24] : memref<2x128x128xf32, #tpu.memory_space<vmem>>, vector<1x128x128xf32>
    %26 = vector.shape_cast %25 : vector<1x128x128xf32> to vector<128x128xf32>
    %27 = arith.addf %24, %26 : vector<128x128xf32>
    %28 = arith.truncf %27 : vector<128x128xf32> to vector<128x128xbf16>
    %c1_25 = arith.constant 1 : index
    %c0_26 = arith.constant 0 : index
    %c0_27 = arith.constant 0 : index
    %29 = vector.load %arg3[%c1_25, %c0_26, %c0_27] : memref<2x128x128xbf16, #tpu.memory_space<vmem>>, vector<1x128x128xbf16>
    %30 = vector.shape_cast %29 : vector<1x128x128xbf16> to vector<128x128xbf16>
    %cst_28 = arith.constant dense<0.000000e+00> : vector<128x128xf32>
    %31 = tpu.matmul %28, %30, %cst_28 {dimension_numbers = #tpu.dot_dimension_numbers<[1], [0], [0], [1], [0, 0, 1, 1], [], []>} : vector<128x128xbf16>, vector<128x128xbf16>, vector<128x128xf32> -> vector<128x128xf32>
    %c1_29 = arith.constant 1 : index
    %c0_30 = arith.constant 0 : index
    %c0_31 = arith.constant 0 : index
    %32 = vector.load %arg4[%c1_29, %c0_30, %c0_31] : memref<2x1x128xf32, #tpu.memory_space<vmem>>, vector<1x1x128xf32>
    %33 = vector.shape_cast %32 : vector<1x1x128xf32> to vector<1x128xf32>
    %34 = vector.broadcast %33 : vector<1x128xf32> to vector<128x128xf32>
    %35 = arith.addf %31, %34 : vector<128x128xf32>
    %c0_32 = arith.constant 0 : index
    %c0_33 = arith.constant 0 : index
    %36 = vector.load %arg9[%c0_32, %c0_33] : memref<128x128xf32, #tpu.memory_space<vmem>>, vector<128x128xf32>
    tpu.vector_store %arg9[%c0_32, %c0_33], %35 {strides = array<i32>} : memref<128x128xf32, #tpu.memory_space<vmem>>, vector<128x128xf32>,
    %c0_34 = arith.constant 0 : index
    %c0_35 = arith.constant 0 : index
    %37 = vector.load %arg5[%c0_34, %c0_35] : memref<8x128xbf16, #tpu.memory_space<vmem>>, vector<8x128xbf16>
    %c0_36 = arith.constant 0 : index
    %c0_37 = arith.constant 0 : index
    %38 = vector.load %arg9[%c0_36, %c0_37] : memref<128x128xf32, #tpu.memory_space<vmem>>, vector<128x128xf32>
    %39 = arith.truncf %38 : vector<128x128xf32> to vector<128x128xbf16>
    %cst_38 = arith.constant dense<0.000000e+00> : vector<8x128xf32>
    %40 = tpu.matmul %37, %39, %cst_38 {dimension_numbers = #tpu.dot_dimension_numbers<[1], [0], [0], [1], [0, 0, 1, 1], [], []>} : vector<8x128xbf16>, vector<128x128xbf16>, vector<8x128xf32> -> vector<8x128xf32>
    %41 = arith.truncf %40 : vector<8x128xf32> to vector<8x128xbf16>
    %c0_39 = arith.constant 0 : index
    %c0_40 = arith.constant 0 : index
    %42 = vector.load %arg6[%c0_39, %c0_40] : memref<128x128xbf16, #tpu.memory_space<vmem>>, vector<128x128xbf16>
    %cst_41 = arith.constant dense<0.000000e+00> : vector<8x128xf32>
    %43 = tpu.matmul %41, %42, %cst_41 {dimension_numbers = #tpu.dot_dimension_numbers<[1], [0], [0], [1], [0, 0, 1, 1], [], []>} : vector<8x128xbf16>, vector<128x128xbf16>, vector<8x128xf32> -> vector<8x128xf32>
    %c0_42 = arith.constant 0 : index
    %c0_43 = arith.constant 0 : index
    %44 = vector.load %arg7[%c0_42, %c0_43] : memref<1x128xf32, #tpu.memory_space<vmem>>, vector<1x128xf32>
    %45 = vector.broadcast %44 : vector<1x128xf32> to vector<8x128xf32>
    %46 = arith.addf %43, %45 : vector<8x128xf32>
    %c0_44 = arith.constant 0 : index
    %c0_45 = arith.constant 0 : index
    %47 = vector.load %arg8[%c0_44, %c0_45] : memref<8x128xf32, #tpu.memory_space<vmem>>, vector<8x128xf32>
    tpu.vector_store %arg8[%c0_44, %c0_45], %46 {strides = array<i32>} : memref<8x128xf32, #tpu.memory_space<vmem>>, vector<8x128xf32>,
    return
  }
}

</mosaic_0001>

<bundles_post_ra>
// kernel: tpu_custom_call.1
= control target key start
LH: loop header
LB: loop body
LE: loop exit
PB: predicated region body
PF: predicated region fallthrough
CT: control target
= control target key end

     0   :  { %13 = vsyncpa [#allocation4], 0  ;;  %s1973_s0 = inlined_call_operand.hbm [shape: f32[128,128], index: 0, kind: input, shape index: {}]   ;;  %s1974_s1 = inlined_call_operand.hbm [shape: bf16[128,128], index: 1, kind: input, shape index: {}]   ;;  %s1975_s2 = inlined_call_operand.hbm [shape: f32[2,128,128], index: 2, kind: input, shape index: {}]   ;;  %s1976_s3 = inlined_call_operand.hbm [shape: bf16[2,128,128], index: 3, kind: input, shape index: {}]   ;;  %s1977_s4 = inlined_call_operand.vmem [shape: f32[2,1,128], index: 4, kind: input, shape index: {}]   ;;  %s1978_s5 = inlined_call_operand.vmem [shape: bf16[8,128], index: 5, kind: input, shape index: {}]   ;;  %s1979_s6 = inlined_call_operand.hbm [shape: bf16[128,128], index: 6, kind: input, shape index: {}]   ;;  %s1980_s7 = inlined_call_operand.vmem [shape: f32[1,128], index: 7, kind: input, shape index: {}]   ;;  %s1981_s8 = inlined_call_operand.hbm [shape: f32[8,128], index: 8, kind: output, shape index: {}]  }
   0x1   :  { %14 = vsyncpa [#allocation7], 0 }
   0x2   :  { %15 = vsyncpa [#allocation10], 0 }
   0x3   :  { %16 = vsyncpa [#allocation5], 0  ;;  %s1601_s27 = smov [#allocation6]   ;;  %s1461_s9 = scalar_lea.hbm %s1974_s1, 1024 }
   0x4   :  { %s34_s28 = sshll.u32 %s1601_s27, 4  ;;  %p1462_p0 = scmp.ne.s32.totalorder %s1974_s1, %s1461_s9  ;;  %s35_s28 = int_to_ptr.vmem [resolvable:$true] %s34_s28 }
   0x5   :  { %p1465_p1 = scmp.lt.u32.totalorder %s1461_s9, %s1974_s1 }
   0x7   :  { %p1467_p2 = pnand %p1465_p1, %p1462_p0 }
   0x9   :  { %1470 = shalt.err (!%p1467_p2)
}
   0xa   :  { %s1471_s14 = scalar_lea.vmem %s35_s28, 1024  ;;  %p1476_p4 = scmp.lt.s32.totalorder %s35_s28, %s35_s28 }
   0xb   :  { %p1472_p3 = scmp.ne.s32.totalorder %s35_s28, %s1471_s14  ;;  %p1477_p5 = scmp.lt.s32.totalorder %s1471_s14, %s1471_s14 }
   0xd   :  { %p1478_p6 = por %p1477_p5, %p1476_p4 }
   0xf   :  { %p1479_p7 = pnand %p1478_p6, %p1472_p3 }
  0x11   :  { %1482 = shalt.err (!%p1479_p7)
}
  0x12   :  { %s1602_s15 = smov 64   ;;  %s1603_s16 = smov 4  }
  0x13   :  { %40 = dma.hbm_to_vmem [thread:$0]  %s1974_s1, 1024, %s35_s28, [#allocation7], %s1602_s15, %s1602_s15, %s1603_s16  }
  0x14   :  { %s1604_s19 = smov [#allocation9]   ;;  %s1605_s21 = smov [#allocation3]  }
  0x15   :  { %s58_s20 = sshll.u32 %s1604_s19, 4  ;;  %s22_s22 = sshll.u32 %s1605_s21, 4  ;;  %s59_s20 = int_to_ptr.vmem [resolvable:$true] %s58_s20  ;;  %s23_s22 = int_to_ptr.vmem [resolvable:$true] %s22_s22 }
  0x16   :  { %s1483_s25 = scalar_lea.hbm %s1976_s3, 2048 }
  0x17   :  { %p1484_p8 = scmp.ne.s32.totalorder %s1976_s3, %s1483_s25  ;;  %p1487_p9 = scmp.lt.u32.totalorder %s1483_s25, %s1976_s3 }
  0x19   :  { %p1489_p10 = pnand %p1487_p9, %p1484_p8 }
  0x1b   :  { %1492 = shalt.err (!%p1489_p10)
}
  0x1c   :  { %s1493_s1 = scalar_lea.vmem %s59_s20, 2048  ;;  %p1498_p12 = scmp.lt.s32.totalorder %s59_s20, %s59_s20 }
  0x1d   :  { %p1494_p11 = scmp.ne.s32.totalorder %s59_s20, %s1493_s1  ;;  %p1499_p13 = scmp.lt.s32.totalorder %s1493_s1, %s1493_s1 }
  0x1f   :  { %p1500_p0 = por %p1499_p13, %p1498_p12 }
  0x21   :  { %p1501_p1 = pnand %p1500_p0, %p1494_p11 }
  0x23   :  { %1504 = shalt.err (!%p1501_p1)
}
  0x24   :  { %64 = dma.hbm_to_vmem [thread:$0]  %s1976_s3, 2048, %s59_s20, [#allocation10], %s1602_s15, %s1602_s15, %s1603_s16  }
  0x25   :  { %s1505_s12 = scalar_lea.hbm %s1973_s0, 2048 }
  0x26   :  { %p1506_p2 = scmp.ne.s32.totalorder %s1973_s0, %s1505_s12  ;;  %p1509_p3 = scmp.lt.u32.totalorder %s1505_s12, %s1973_s0 }
  0x28   :  { %p1511_p4 = pnand %p1509_p3, %p1506_p2 }
  0x2a   :  { %1514 = shalt.err (!%p1511_p4)
}
  0x2b   :  { %s1515_s19 = scalar_lea.vmem %s23_s22, 2048  ;;  %p1520_p6 = scmp.lt.s32.totalorder %s23_s22, %s23_s22 }
  0x2c   :  { %p1516_p5 = scmp.ne.s32.totalorder %s23_s22, %s1515_s19  ;;  %p1521_p7 = scmp.lt.s32.totalorder %s1515_s19, %s1515_s19 }
  0x2e   :  { %p1522_p8 = por %p1521_p7, %p1520_p6 }
  0x30   :  { %p1523_p9 = pnand %p1522_p8, %p1516_p5 }
  0x32   :  { %1526 = shalt.err (!%p1523_p9)
}
  0x33   :  { %s1606_s3 = smov 128   ;;  %s1607_s20 = smov 8  }
  0x34   :  { %28 = dma.hbm_to_vmem [thread:$0]  %s1973_s0, 2048, %s23_s22, [#allocation4], %s1606_s3, %s1606_s3, %s1607_s20  }
  0x35   :  { %s1608_s24 = smov [#allocation8]   ;;  %s1609_s26 = smov [#allocation11]  }
  0x36   :  { %s46_s25 = sshll.u32 %s1608_s24, 4  ;;  %s74_s27 = sshll.u32 %s1609_s26, 4  ;;  %s47_s25 = int_to_ptr.vmem [resolvable:$true] %s46_s25  ;;  %s75_s27 = int_to_ptr.vmem [resolvable:$true] %s74_s27 }
  0x37   :  { %s1527_s1 = scalar_lea.hbm %s1975_s2, 4096 }
  0x38   :  { %p1528_p10 = scmp.ne.s32.totalorder %s1975_s2, %s1527_s1  ;;  %p1531_p11 = scmp.lt.u32.totalorder %s1527_s1, %s1975_s2 }
  0x3a   :  { %p1533_p12 = pnand %p1531_p11, %p1528_p10 }
  0x3c   :  { %1536 = shalt.err (!%p1533_p12)
}
  0x3d   :  { %s1537_s0 = scalar_lea.vmem %s47_s25, 4096  ;;  %p1542_p0 = scmp.lt.s32.totalorder %s47_s25, %s47_s25 }
  0x3e   :  { %p1538_p13 = scmp.ne.s32.totalorder %s47_s25, %s1537_s0  ;;  %p1543_p1 = scmp.lt.s32.totalorder %s1537_s0, %s1537_s0 }
  0x40   :  { %p1544_p2 = por %p1543_p1, %p1542_p0 }
  0x42   :  { %p1545_p3 = pnand %p1544_p2, %p1538_p13 }
  0x44   :  { %1548 = shalt.err (!%p1545_p3)
}
  0x45   :  { %52 = dma.hbm_to_vmem [thread:$0]  %s1975_s2, 4096, %s47_s25, [#allocation7], %s1606_s3, %s1606_s3, %s1607_s20  }
  0x46   :  { %s1549_s17 = scalar_lea.hbm %s1979_s6, 1024 }
  0x47   :  { %p1550_p4 = scmp.ne.s32.totalorder %s1979_s6, %s1549_s17  ;;  %p1553_p5 = scmp.lt.u32.totalorder %s1549_s17, %s1979_s6 }
  0x49   :  { %p1555_p6 = pnand %p1553_p5, %p1550_p4 }
  0x4b   :  { %1558 = shalt.err (!%p1555_p6)
}
  0x4c   :  { %s1559_s24 = scalar_lea.vmem %s75_s27, 1024  ;;  %p1564_p8 = scmp.lt.s32.totalorder %s75_s27, %s75_s27 }
  0x4d   :  { %p1560_p7 = scmp.ne.s32.totalorder %s75_s27, %s1559_s24  ;;  %p1565_p9 = scmp.lt.s32.totalorder %s1559_s24, %s1559_s24 }
  0x4f   :  { %p1566_p10 = por %p1565_p9, %p1564_p8 }
  0x51   :  { %p1567_p11 = pnand %p1566_p10, %p1560_p7 }
  0x53   :  { %1570 = shalt.err (!%p1567_p11)
}
  0x54   :  { %80 = dma.hbm_to_vmem [thread:$0]  %s1979_s6, 1024, %s75_s27, [#allocation10], %s1602_s15, %s1602_s15, %s1603_s16  }
  0x55   :  { %1593 = dma.done.wait [#allocation4], 2048  }
  0x56   :  { %1594 = vsyncadd [#allocation4], 4294965248 }
  0x57   :  { %1595 = dma.done.wait [#allocation7], 5120  }
  0x58   :  { %1596 = vsyncadd [#allocation7], 4294962176 }
  0x59   :  { %1597 = dma.done.wait [#allocation10], 3072  }
  0x5a   :  { %1598 = vsyncadd [#allocation10], 4294964224  ;;  %v1727_v0 = vld [vmem:[#allocation3] sm:$0xff]  ;;  %v1729_v1 = vld [vmem:[#allocation3 + $0x8] sm:$0xff]  ;;  %vm1611_vm0 = vmmov 0   ;;  %s1612_s29 = smov [#allocation12]  }
  0x5b   :  { %v1731_v2 = vld [vmem:[#allocation3 + $0x10] sm:$0xff]  ;;  %v163_v3 = vpack.c.bf16 %v1729_v1, %v1727_v0  ;;  %v1735_v4 = vld [vmem:[#allocation3 + $0x18] sm:$0xff]  ;;  %v1739_v6 = vld [vmem:[#allocation3 + $0x20] sm:$0xff]  ;;  %s1120_s30 = sshll.u32 %s1612_s29, 4  ;;  %s1121_s30 = int_to_ptr.vmem [resolvable:$true] %s1120_s30 }
  0x5c   :  { %v164_v5 = vpack.c.bf16 %v1735_v4, %v1731_v2  ;;  %v1741_v7 = vld [vmem:[#allocation3 + $0x28] sm:$0xff]  ;;  %v1743_v8 = vld [vmem:[#allocation3 + $0x30] sm:$0xff]  ;;  %v1747_v10 = vld [vmem:[#allocation3 + $0x38] sm:$0xff]  ;;  %p1576_p13 = scmp.lt.s32.totalorder %s1121_s30, %s1121_s30 }
  0x5d   :  { %1249 = vmatprep.subr.bf16.mxu0 %v163_v3  ;;  %v165_v9 = vpack.c.bf16 %v1741_v7, %v1739_v6  ;;  %v1429_v11 = vld [vmem:[#allocation6] sm:$0xff]   ;;  %v166_v12 = vpack.c.bf16 %v1747_v10, %v1743_v8  ;;  %v1753_v14 = vld [vmem:[#allocation3 + $0x48] sm:$0xff]  ;;  %v1755_v15 = vld [vmem:[#allocation3 + $0x50] sm:$0xff] }
  0x5e   :  { %1250 = vmatpush3.bf16.msra.mxu0 %v163_v3  ;;  %1265 = vmatprep.mubr.bf16.mxu0 %v1429_v11  ;;  %v1751_v13 = vld [vmem:[#allocation3 + $0x40] sm:$0xff]  ;;  %v1759_v17 = vld [vmem:[#allocation3 + $0x58] sm:$0xff]  ;;  %v1438_v19 = vld [vmem:[#allocation9 + $0x8] sm:$0xff]  }
  0x5f   :  { %1251 = vmatprep.subr.bf16.mxu0 %v164_v5  ;;  %v167_v16 = vpack.c.bf16 %v1753_v14, %v1751_v13  ;;  %v1437_v18 = vld [vmem:[#allocation9] sm:$0xff]   ;;  %v168_v21 = vpack.c.bf16 %v1759_v17, %v1755_v15  ;;  %v1765_v22 = vld [vmem:[#allocation3 + $0x68] sm:$0xff]  ;;  %v1439_v23 = vld [vmem:[#allocation9 + $0x10] sm:$0xff]  }
  0x60   :  { %v1761_v20 = vld [vmem:[#allocation3 + $0x60] sm:$0xff]  ;;  %1281 = vmatprep.subr.bf16.mxu1 %v1437_v18  ;;  %v1767_v24 = vld [vmem:[#allocation3 + $0x70] sm:$0xff]  ;;  %v1769_v25 = vld [vmem:[#allocation3 + $0x78] sm:$0xff] }
  0x61   :  { %1282 = vmatpush3.bf16.msra.mxu1 %v1437_v18  ;;  %v1440_v26 = vld [vmem:[#allocation9 + $0x18] sm:$0xff]   ;;  %v169_v27 = vpack.c.bf16 %v1765_v22, %v1761_v20  ;;  %v1441_v28 = vld [vmem:[#allocation9 + $0x20] sm:$0xff]   ;;  %v170_v29 = vpack.c.bf16 %v1769_v25, %v1767_v24  ;;  %v1442_v30 = vld [vmem:[#allocation9 + $0x28] sm:$0xff]  }
  0x62   :  { %1252 = vmatpush3.bf16.msra.mxu0 %v164_v5  ;;  %1283 = vmatprep.subr.bf16.mxu1 %v1438_v19  ;;  %v1775_v31 = vld [vmem:[#allocation6 + $0x8] sm:$0xff]   ;;  %v1777_v32 = vld [vmem:[#allocation6 + $0x10] sm:$0xff]   ;;  %v1781_v33 = vld [vmem:[#allocation6 + $0x18] sm:$0xff]  }
  0x63   :  { %1253 = vmatprep.subr.bf16.mxu0 %v165_v9  ;;  %v1783_v34 = vld [vmem:[#allocation6 + $0x20] sm:$0xff]   ;;  %v1787_v35 = vld [vmem:[#allocation6 + $0x28] sm:$0xff]   ;;  %v1789_v36 = vld [vmem:[#allocation6 + $0x30] sm:$0xff]  }
  0x64   :  { %v1793_v37 = vld [vmem:[#allocation6 + $0x38] sm:$0xff]   ;;  %v1443_v38 = vld [vmem:[#allocation9 + $0x30] sm:$0xff]   ;;  %v332_v49 = vld [vmem:[#allocation8] sm:$0xff] }
  0x65   :  { %1284 = vmatpush3.bf16.msra.mxu1 %v1438_v19  ;;  %v1444_v39 = vld [vmem:[#allocation9 + $0x38] sm:$0xff]   ;;  %v334_v43 = vld [vmem:[#allocation8 + $0x10] sm:$0xff]  ;;  %v333_v50 = vld [vmem:[#allocation8 + $0x8] sm:$0xff] }
  0x66   :  { %1254 = vmatpush3.bf16.msra.mxu0 %v165_v9  ;;  %1285 = vmatprep.subr.bf16.mxu1 %v1439_v23  ;;  %v335_v46 = vld [vmem:[#allocation8 + $0x18] sm:$0xff]  ;;  %v338_v61 = vld [vmem:[#allocation8 + $0x30] sm:$0xff] }
  0x67   :  { %1255 = vmatprep.subr.bf16.mxu0 %v166_v12 }
  0x69   :  { %1286 = vmatpush3.bf16.msra.mxu1 %v1439_v23  ;;  %v342_v23 = vld [vmem:[#allocation8 + $0x50] sm:$0xff] }
  0x6a   :  { %1256 = vmatpush3.bf16.msra.mxu0 %v166_v12  ;;  %1287 = vmatprep.subr.bf16.mxu1 %v1440_v26 }
  0x6b   :  { %1257 = vmatprep.subr.bf16.mxu0 %v167_v16 }
  0x6d   :  { %1288 = vmatpush3.bf16.msra.mxu1 %v1440_v26 }
  0x6e   :  { %1258 = vmatpush3.bf16.msra.mxu0 %v167_v16  ;;  %1289 = vmatprep.subr.bf16.mxu1 %v1441_v28 }
  0x6f   :  { %1259 = vmatprep.subr.bf16.mxu0 %v168_v21 }
  0x71   :  { %1290 = vmatpush3.bf16.msra.mxu1 %v1441_v28  ;;  %v340_v28 = vld [vmem:[#allocation8 + $0x40] sm:$0xff] }
  0x72   :  { %1260 = vmatpush3.bf16.msra.mxu0 %v168_v21  ;;  %1291 = vmatprep.subr.bf16.mxu1 %v1442_v30 }
  0x73   :  { %1261 = vmatprep.subr.bf16.mxu0 %v169_v27 }
  0x75   :  { %1292 = vmatpush3.bf16.msra.mxu1 %v1442_v30  ;;  %v341_v30 = vld [vmem:[#allocation8 + $0x48] sm:$0xff] }
  0x76   :  { %1262 = vmatpush3.bf16.msra.mxu0 %v169_v27  ;;  %1293 = vmatprep.subr.bf16.mxu1 %v1443_v38 }
  0x77   :  { %1263 = vmatprep.subr.bf16.mxu0 %v170_v29 }
  0x79   :  { %1294 = vmatpush3.bf16.msra.mxu1 %v1443_v38 }
  0x7a   :  { %1264 = vmatpush3.bf16.msra.mxu0 %v170_v29  ;;  %1295 = vmatprep.subr.bf16.mxu1 %v1444_v39 }
  0x7d   :  { %1266 = vmatmul.mubr.bf16.vlgmr.msra.gmra.mrb[0].mxu0 %v1775_v31  ;;  %1296 = vmatpush3.bf16.msra.mxu1 %v1444_v39 }
  0x7e   :  { %1269 = vmatprep.mubr.bf16.mxu0 %v1777_v32 }
  0x85   :  { %1270 = vmatmul.mubr.bf16.gmra.mrb[4].mxu0 %v1781_v33 }
  0x86   :  { %1273 = vmatprep.mubr.bf16.mxu0 %v1783_v34 }
  0x8d   :  { %1274 = vmatmul.mubr.bf16.gmra.mrb[8].mxu0 %v1787_v35 }
  0x8e   :  { %1277 = vmatprep.mubr.bf16.mxu0 %v1789_v36 }
  0x95   :  { %1278 = vmatmul.mubr.bf16.gmra.mrb[12].mxu0 %v1793_v37 }
  0x96   :  { %1329 = vmatprep.mubr.bf16.mxu0 %v1429_v11 }
 0x150   :  { %v1267_v40 = vpop.f32.mrb[0].mxu0 }
 0x151   :  { %v318_v41 = vadd.f32 %v1267_v40, %v1731_v2  ;;  %v253_v42 = vpop.f32.mrb[1].mxu0  ;;  %v336_v2 = vld [vmem:[#allocation8 + $0x20] sm:$0xff] }
 0x152   :  { %v316_v44 = vadd.f32 %v253_v42, %v1727_v0  ;;  %v1268_v45 = vpop.f32.mrb[2].mxu0  ;;  %v339_v0 = vld [vmem:[#allocation8 + $0x38] sm:$0xff] }
 0x153   :  { %v319_v47 = vadd.f32 %v1268_v45, %v1735_v4  ;;  %v256_v48 = vpop.f32.mrb[3].mxu0  ;;  %v350_v52 = vadd.f32 %v334_v43, %v318_v41  ;;  %v337_v4 = vld [vmem:[#allocation8 + $0x28] sm:$0xff] }
 0x154   :  { %v317_v51 = vadd.f32 %v256_v48, %v1729_v1  ;;  %v348_v54 = vadd.f32 %v332_v49, %v316_v44  ;;  %v344_v49 = vld [vmem:[#allocation8 + $0x60] sm:$0xff] }
 0x155   :  { %v351_v53 = vadd.f32 %v335_v46, %v319_v47  ;;  %v346_v46 = vld [vmem:[#allocation8 + $0x70] sm:$0xff] }
 0x156   :  { %v349_v55 = vadd.f32 %v333_v50, %v317_v51  ;;  %v345_v51 = vld [vmem:[#allocation8 + $0x68] sm:$0xff] }
 0x157   :  { %v365_v56 = vpack.c.bf16 %v351_v53, %v350_v52 }
 0x158   :  { %v1271_v57 = vpop.f32.mrb[4].mxu0  ;;  %v364_v58 = vpack.c.bf16 %v349_v55, %v348_v54 }
 0x159   :  { %v322_v59 = vadd.f32 %v1271_v57, %v1743_v8  ;;  %v269_v60 = vpop.f32.mrb[5].mxu0 }
 0x15a   :  { %v320_v62 = vadd.f32 %v269_v60, %v1739_v6  ;;  %v1272_v63 = vpop.f32.mrb[6].mxu0  ;;  %1297 = vmatprep.mubr.bf16.mxu1 %v364_v58  ;;  %v1446_v58 = vld [vmem:[#allocation9 + $0x48] sm:$0xff]  }
 0x15b   :  { %v323_v3 = vadd.f32 %v1272_v63, %v1747_v10  ;;  %v272_v1 = vpop.f32.mrb[7].mxu0  ;;  %1298 = vmatmul.mubr.bf16.vlgmr.msra.gmra.mrb[0].mxu1 %v365_v56  ;;  %v354_v9 = vadd.f32 %v338_v61, %v322_v59  ;;  %v343_v10 = vld [vmem:[#allocation8 + $0x58] sm:$0xff]  ;;  %v1447_v59 = vld [vmem:[#allocation9 + $0x50] sm:$0xff]   ;;  %v1450_v60 = vld [vmem:[#allocation9 + $0x68] sm:$0xff]  }
 0x15c   :  { %v321_v5 = vadd.f32 %v272_v1, %v1741_v7  ;;  %v352_v12 = vadd.f32 %v336_v2, %v320_v62  ;;  %v1139_v61 = vld [vmem:[%s1977_s4] ss:$0 sm:$0xff] }
 0x15d   :  { %v355_v11 = vadd.f32 %v339_v0, %v323_v3 }
 0x15e   :  { %v353_v16 = vadd.f32 %v337_v4, %v321_v5 }
 0x15f   :  { %v367_v8 = vpack.c.bf16 %v355_v11, %v354_v9 }
 0x160   :  { %v1275_v18 = vpop.f32.mrb[8].mxu0  ;;  %v366_v19 = vpack.c.bf16 %v353_v16, %v352_v12 }
 0x161   :  { %v326_v6 = vadd.f32 %v1275_v18, %v1755_v15  ;;  %v285_v21 = vpop.f32.mrb[9].mxu0 }
 0x162   :  { %v324_v26 = vadd.f32 %v285_v21, %v1751_v13  ;;  %v1276_v27 = vpop.f32.mrb[10].mxu0  ;;  %1301 = vmatprep.mubr.bf16.mxu1 %v366_v19 }
 0x163   :  { %v327_v29 = vadd.f32 %v1276_v27, %v1759_v17  ;;  %v288_v7 = vpop.f32.mrb[11].mxu0  ;;  %1302 = vmatmul.mubr.bf16.gmra.mrb[4].mxu1 %v367_v8  ;;  %v358_v39 = vadd.f32 %v342_v23, %v326_v6  ;;  %v347_v17 = vld [vmem:[#allocation8 + $0x78] sm:$0xff] }
 0x164   :  { %v325_v38 = vadd.f32 %v288_v7, %v1753_v14  ;;  %v356_v41 = vadd.f32 %v340_v28, %v324_v26 }
 0x165   :  { %v359_v40 = vadd.f32 %v343_v10, %v327_v29 }
 0x166   :  { %v357_v42 = vadd.f32 %v341_v30, %v325_v38 }
 0x167   :  { %v369_v15 = vpack.c.bf16 %v359_v40, %v358_v39 }
 0x168   :  { %v1279_v43 = vpop.f32.mrb[12].mxu0  ;;  %v368_v44 = vpack.c.bf16 %v357_v42, %v356_v41 }
 0x169   :  { %v330_v13 = vadd.f32 %v1279_v43, %v1767_v24  ;;  %v301_v45 = vpop.f32.mrb[13].mxu0 }
 0x16a   :  { %v328_v47 = vadd.f32 %v301_v45, %v1761_v20  ;;  %v1280_v48 = vpop.f32.mrb[14].mxu0  ;;  %1305 = vmatprep.mubr.bf16.mxu1 %v368_v44  ;;  %v1445_v20 = vld [vmem:[#allocation9 + $0x40] sm:$0xff]  }
 0x16b   :  { %v331_v50 = vadd.f32 %v1280_v48, %v1769_v25  ;;  %v304_v14 = vpop.f32.mrb[15].mxu0  ;;  %1306 = vmatmul.mubr.bf16.gmra.mrb[8].mxu1 %v369_v15  ;;  %v362_v53 = vadd.f32 %v346_v46, %v330_v13  ;;  %1345 = vmatprep.subr.bf16.mxu1 %v1445_v20  ;;  %v1448_v25 = vld [vmem:[#allocation9 + $0x58] sm:$0xff]  }
 0x16c   :  { %v329_v52 = vadd.f32 %v304_v14, %v1765_v22  ;;  %v360_v55 = vadd.f32 %v344_v49, %v328_v47  ;;  %1346 = vmatpush3.bf16.msra.mxu1 %v1445_v20  ;;  %v1449_v22 = vld [vmem:[#allocation9 + $0x60] sm:$0xff]  }
 0x16d   :  { %v363_v54 = vadd.f32 %v347_v17, %v331_v50  ;;  %1347 = vmatprep.subr.bf16.mxu1 %v1446_v58 }
 0x16e   :  { %v361_v56 = vadd.f32 %v345_v51, %v329_v52 }
 0x16f   :  { %v371_v24 = vpack.c.bf16 %v363_v54, %v362_v53 }
 0x170   :  { %v370_v57 = vpack.c.bf16 %v361_v56, %v360_v55  ;;  %1348 = vmatpush3.bf16.msra.mxu1 %v1446_v58 }
 0x171   :  { %1349 = vmatprep.subr.bf16.mxu1 %v1447_v59 }
 0x172   :  { %1309 = vmatprep.mubr.bf16.mxu1 %v370_v57 }
 0x173   :  { %1310 = vmatmul.mubr.bf16.gmra.mrb[12].mxu1 %v371_v24 }
 0x174   :  { %1350 = vmatpush3.bf16.msra.mxu1 %v1447_v59 }
 0x175   :  { %1351 = vmatprep.subr.bf16.mxu1 %v1448_v25 }
 0x178   :  { %1352 = vmatpush3.bf16.msra.mxu1 %v1448_v25 }
 0x179   :  { %1353 = vmatprep.subr.bf16.mxu1 %v1449_v22 }
 0x17c   :  { %1354 = vmatpush3.bf16.msra.mxu1 %v1449_v22 }
 0x17d   :  { %1355 = vmatprep.subr.bf16.mxu1 %v1450_v60 }
 0x180   :  { %1356 = vmatpush3.bf16.msra.mxu1 %v1450_v60 }
 0x22e   :  { %v1299_v62 = vpop.f32.mrb[0].mxu1 }
 0x22f   :  { %v477_v63 = vpop.f32.mrb[1].mxu1  ;;  %v1819_v4 = vadd.f32 %v1299_v62, %v1139_v61  ;;  %v1452_v62 = vld [vmem:[#allocation9 + $0x78] sm:$0xff]  }
 0x230   :  { %v1815_v0 = vadd.f32 %v1139_v61, %v477_v63  ;;  %v1300_v2 = vpop.f32.mrb[2].mxu1 }
 0x231   :  { %v1817_v3 = vadd.f32 %v1300_v2, %v1139_v61  ;;  %v480_v1 = vpop.f32.mrb[3].mxu1  ;;  %v542_v16 = vmax.f32 %v1819_v4, 0.0  ;;  %v713_v2 = vld [vmem:[#allocation8 + $0x98] sm:$0xff] }
 0x232   :  { %v1821_v5 = vadd.f32 %v1139_v61, %v480_v1  ;;  %v540_v9 = vmax.f32 %v1815_v0, 0.0 }
 0x233   :  { %v543_v11 = vmax.f32 %v1817_v3, 0.0 }
 0x234   :  { %v541_v12 = vmax.f32 %v1821_v5, 0.0  ;;  %v714_v5 = vld [vmem:[#allocation8 + $0xa0] sm:$0xff] }
 0x235   :  { %v589_v6 = vpack.c.bf16 %v543_v11, %v542_v16 }
 0x236   :  { %v588_v8 = vpack.c.bf16 %v541_v12, %v540_v9  ;;  %v1303_v18 = vpop.f32.mrb[4].mxu1 }
 0x237   :  { %v493_v19 = vpop.f32.mrb[5].mxu1  ;;  %v1839_v10 = vadd.f32 %v1303_v18, %v1139_v61 }
 0x238   :  { %v1835_v21 = vadd.f32 %v1139_v61, %v493_v19  ;;  %v1304_v23 = vpop.f32.mrb[6].mxu1  ;;  %1313 = vmatprep.subr.bf16.mxu0 %v588_v8 }
 0x239   :  { %v1837_v26 = vadd.f32 %v1304_v23, %v1139_v61  ;;  %v496_v27 = vpop.f32.mrb[7].mxu1  ;;  %1314 = vmatpush3.bf16.msra.mxu0 %v588_v8  ;;  %v546_v38 = vmax.f32 %v1839_v10, 0.0  ;;  %v711_v8 = vld [vmem:[#allocation8 + $0x88] sm:$0xff] }
 0x23a   :  { %v1841_v28 = vadd.f32 %v1139_v61, %v496_v27  ;;  %1315 = vmatprep.subr.bf16.mxu0 %v589_v6  ;;  %v544_v29 = vmax.f32 %v1835_v21, 0.0 }
 0x23b   :  { %v547_v7 = vmax.f32 %v1837_v26, 0.0 }
 0x23c   :  { %v545_v30 = vmax.f32 %v1841_v28, 0.0  ;;  %v718_v28 = vld [vmem:[#allocation8 + $0xc0] sm:$0xff] }
 0x23d   :  { %1316 = vmatpush3.bf16.msra.mxu0 %v589_v6  ;;  %v591_v42 = vpack.c.bf16 %v547_v7, %v546_v38 }
 0x23e   :  { %v590_v39 = vpack.c.bf16 %v545_v30, %v544_v29  ;;  %v1307_v40 = vpop.f32.mrb[8].mxu1 }
 0x23f   :  { %v509_v41 = vpop.f32.mrb[9].mxu1  ;;  %v1859_v45 = vadd.f32 %v1307_v40, %v1139_v61  ;;  %v716_v40 = vld [vmem:[#allocation8 + $0xb0] sm:$0xff] }
 0x240   :  { %v1855_v15 = vadd.f32 %v1139_v61, %v509_v41  ;;  %v1308_v43 = vpop.f32.mrb[10].mxu1  ;;  %1317 = vmatprep.subr.bf16.mxu0 %v590_v39  ;;  %v717_v41 = vld [vmem:[#allocation8 + $0xb8] sm:$0xff] }
 0x241   :  { %v1857_v44 = vadd.f32 %v1308_v43, %v1139_v61  ;;  %v512_v13 = vpop.f32.mrb[11].mxu1  ;;  %1318 = vmatpush3.bf16.msra.mxu0 %v590_v39  ;;  %v550_v49 = vmax.f32 %v1859_v45, 0.0  ;;  %v715_v43 = vld [vmem:[#allocation8 + $0xa8] sm:$0xff] }
 0x242   :  { %v1861_v46 = vadd.f32 %v1139_v61, %v512_v13  ;;  %1319 = vmatprep.subr.bf16.mxu0 %v591_v42  ;;  %v548_v47 = vmax.f32 %v1855_v15, 0.0 }
 0x243   :  { %v551_v48 = vmax.f32 %v1857_v44, 0.0 }
 0x244   :  { %v549_v17 = vmax.f32 %v1861_v46, 0.0  ;;  %v722_v46 = vld [vmem:[#allocation8 + $0xe0] sm:$0xff] }
 0x245   :  { %1320 = vmatpush3.bf16.msra.mxu0 %v591_v42  ;;  %v593_v52 = vpack.c.bf16 %v551_v48, %v550_v49 }
 0x246   :  { %v592_v50 = vpack.c.bf16 %v549_v17, %v548_v47  ;;  %v1311_v14 = vpop.f32.mrb[12].mxu1 }
 0x247   :  { %v525_v51 = vpop.f32.mrb[13].mxu1  ;;  %v1879_v24 = vadd.f32 %v1311_v14, %v1139_v61 }
 0x248   :  { %v1875_v53 = vadd.f32 %v1139_v61, %v525_v51  ;;  %v1312_v54 = vpop.f32.mrb[14].mxu1  ;;  %1321 = vmatprep.subr.bf16.mxu0 %v592_v50 }
 0x249   :  { %v1877_v55 = vadd.f32 %v1312_v54, %v1139_v61  ;;  %v528_v56 = vpop.f32.mrb[15].mxu1  ;;  %1322 = vmatpush3.bf16.msra.mxu0 %v592_v50  ;;  %v554_v25 = vmax.f32 %v1879_v24, 0.0 }
 0x24a   :  { %v1881_v57 = vadd.f32 %v1139_v61, %v528_v56  ;;  %1323 = vmatprep.subr.bf16.mxu0 %v593_v52  ;;  %v552_v20 = vmax.f32 %v1875_v53, 0.0  ;;  %v1451_v61 = vld [vmem:[#allocation9 + $0x70] sm:$0xff]  }
 0x24b   :  { %v555_v58 = vmax.f32 %v1877_v55, 0.0  ;;  %1357 = vmatprep.subr.bf16.mxu1 %v1451_v61  ;;  %v720_v56 = vld [vmem:[#allocation8 + $0xd0] sm:$0xff]  ;;  %v1453_v55 = vld [vmem:[#allocation11] sm:$0xff]  }
 0x24c   :  { %v553_v59 = vmax.f32 %v1881_v57, 0.0  ;;  %1358 = vmatpush3.bf16.msra.mxu1 %v1451_v61  ;;  %v719_v61 = vld [vmem:[#allocation8 + $0xc8] sm:$0xff] }
 0x24d   :  { %1324 = vmatpush3.bf16.msra.mxu0 %v593_v52  ;;  %v595_v60 = vpack.c.bf16 %v555_v58, %v554_v25  ;;  %1359 = vmatprep.subr.bf16.mxu1 %v1452_v62  ;;  %v1454_v57 = vld [vmem:[#allocation11 + $0x8] sm:$0xff]  }
 0x24e   :  { %v594_v22 = vpack.c.bf16 %v553_v59, %v552_v20 }
 0x250   :  { %1325 = vmatprep.subr.bf16.mxu0 %v594_v22  ;;  %1360 = vmatpush3.bf16.msra.mxu1 %v1452_v62 }
 0x251   :  { %1326 = vmatpush3.bf16.msra.mxu0 %v594_v22  ;;  %v721_v22 = vld [vmem:[#allocation8 + $0xd8] sm:$0xff] }
 0x252   :  { %1327 = vmatprep.subr.bf16.mxu0 %v595_v60 }
 0x255   :  { %1328 = vmatpush3.bf16.msra.mxu0 %v595_v60 }
 0x258   :  { %1330 = vmatmul.mubr.bf16.vlgmr.msra.gmra.mrb[16].mxu0 %v1775_v31 }
 0x259   :  { %1333 = vmatprep.mubr.bf16.mxu0 %v1777_v32 }
 0x260   :  { %1334 = vmatmul.mubr.bf16.gmra.mrb[20].mxu0 %v1781_v33  ;;  %v712_v33 = vld [vmem:[#allocation8 + $0x90] sm:$0xff] }
 0x261   :  { %1337 = vmatprep.mubr.bf16.mxu0 %v1783_v34 }
 0x268   :  { %1338 = vmatmul.mubr.bf16.gmra.mrb[24].mxu0 %v1787_v35 }
 0x269   :  { %1341 = vmatprep.mubr.bf16.mxu0 %v1789_v36  ;;  %v710_v36 = vld [vmem:[#allocation8 + $0x80] sm:$0xff] }
 0x270   :  { %1342 = vmatmul.mubr.bf16.gmra.mrb[28].mxu0 %v1793_v37 }
 0x32b   :  { %v1331_v63 = vpop.f32.mrb[16].mxu0 }
 0x32c   :  { %v695_v31 = vadd.f32 %v1331_v63, %v542_v16  ;;  %v630_v32 = vpop.f32.mrb[17].mxu0 }
 0x32d   :  { %v693_v34 = vadd.f32 %v630_v32, %v540_v9  ;;  %v1332_v35 = vpop.f32.mrb[18].mxu0 }
 0x32e   :  { %v696_v37 = vadd.f32 %v1332_v35, %v543_v11  ;;  %v633_v1 = vpop.f32.mrb[19].mxu0  ;;  %v728_v19 = vadd.f32 %v712_v33, %v695_v31  ;;  %v724_v35 = vld [vmem:[#allocation8 + $0xf0] sm:$0xff] }
 0x32f   :  { %v694_v18 = vadd.f32 %v633_v1, %v541_v12  ;;  %v726_v4 = vadd.f32 %v710_v36, %v693_v34 }
 0x330   :  { %v729_v6 = vadd.f32 %v713_v2, %v696_v37  ;;  %v725_v2 = vld [vmem:[#allocation8 + $0xf8] sm:$0xff]  ;;  %v723_v37 = vld [vmem:[#allocation8 + $0xe8] sm:$0xff] }
 0x331   :  { %v727_v16 = vadd.f32 %v711_v8, %v694_v18 }
 0x332   :  { %v743_v23 = vpack.c.bf16 %v729_v6, %v728_v19  ;;  %v1457_v6 = vld [vmem:[#allocation11 + $0x20] sm:$0xff]  }
 0x333   :  { %v1335_v27 = vpop.f32.mrb[20].mxu0  ;;  %v742_v39 = vpack.c.bf16 %v727_v16, %v726_v4  ;;  %v1458_v4 = vld [vmem:[#allocation11 + $0x28] sm:$0xff]   ;;  %v1459_v16 = vld [vmem:[#allocation11 + $0x30] sm:$0xff]  }
 0x334   :  { %v699_v0 = vadd.f32 %v1335_v27, %v546_v38  ;;  %v646_v9 = vpop.f32.mrb[21].mxu0  ;;  %v1149_v27 = vld [vmem:[%s1977_s4 + $0x1] ss:$0 sm:$0xff] }
 0x335   :  { %v697_v3 = vadd.f32 %v646_v9, %v544_v29  ;;  %v1336_v11 = vpop.f32.mrb[22].mxu0  ;;  %1361 = vmatprep.mubr.bf16.mxu1 %v742_v39 }
 0x336   :  { %v700_v12 = vadd.f32 %v1336_v11, %v547_v7  ;;  %v649_v42 = vpop.f32.mrb[23].mxu0  ;;  %1362 = vmatmul.mubr.bf16.vlgmr.msra.gmra.mrb[16].mxu1 %v743_v23  ;;  %v732_v10 = vadd.f32 %v716_v40, %v699_v0 }
 0x337   :  { %v698_v13 = vadd.f32 %v649_v42, %v545_v30  ;;  %v730_v50 = vadd.f32 %v714_v5, %v697_v3 }
 0x338   :  { %v733_v38 = vadd.f32 %v717_v41, %v700_v12 }
 0x339   :  { %v731_v14 = vadd.f32 %v715_v43, %v698_v13 }
 0x33a   :  { %v745_v51 = vpack.c.bf16 %v733_v38, %v732_v10 }
 0x33b   :  { %v1339_v21 = vpop.f32.mrb[24].mxu0  ;;  %v744_v29 = vpack.c.bf16 %v731_v14, %v730_v50 }
 0x33c   :  { %v703_v52 = vadd.f32 %v1339_v21, %v550_v49  ;;  %v662_v54 = vpop.f32.mrb[25].mxu0 }
 0x33d   :  { %v701_v26 = vadd.f32 %v662_v54, %v548_v47  ;;  %v1340_v7 = vpop.f32.mrb[26].mxu0  ;;  %1365 = vmatprep.mubr.bf16.mxu1 %v744_v29 }
 0x33e   :  { %v704_v30 = vadd.f32 %v1340_v7, %v551_v48  ;;  %v665_v60 = vpop.f32.mrb[27].mxu0  ;;  %1366 = vmatmul.mubr.bf16.gmra.mrb[20].mxu1 %v745_v51  ;;  %v736_v45 = vadd.f32 %v720_v56, %v703_v52 }
 0x33f   :  { %v702_v62 = vadd.f32 %v665_v60, %v549_v17  ;;  %v734_v63 = vadd.f32 %v718_v28, %v701_v26 }
 0x340   :  { %v737_v49 = vadd.f32 %v721_v22, %v704_v30 }
 0x341   :  { %v735_v31 = vadd.f32 %v719_v61, %v702_v62 }
 0x342   :  { %v747_v32 = vpack.c.bf16 %v737_v49, %v736_v45 }
 0x343   :  { %v1343_v15 = vpop.f32.mrb[28].mxu0  ;;  %v746_v47 = vpack.c.bf16 %v735_v31, %v734_v63 }
 0x344   :  { %v707_v33 = vadd.f32 %v1343_v15, %v554_v25  ;;  %v678_v34 = vpop.f32.mrb[29].mxu0 }
 0x345   :  { %v705_v44 = vadd.f32 %v678_v34, %v552_v20  ;;  %v1344_v48 = vpop.f32.mrb[30].mxu0  ;;  %1369 = vmatprep.mubr.bf16.mxu1 %v746_v47  ;;  %v1610_v20 = vmov 0.0  }
 0x346   :  { %v708_v17 = vadd.f32 %v1344_v48, %v555_v58  ;;  %v681_v36 = vpop.f32.mrb[31].mxu0  ;;  %1370 = vmatmul.mubr.bf16.gmra.mrb[24].mxu1 %v747_v32  ;;  %v740_v24 = vadd.f32 %v724_v35, %v707_v33  ;;  %1377 = vmatprep.subr.bf16.mxu0 %v1610_v20  ;;  %v1455_v58 = vld [vmem:[#allocation11 + $0x10] sm:$0xff]   ;;  %v936_v35 = vld [vmem:[%s1978_s5] sm:$0xf]  ;;  %s1571_s5 = scalar_lea.vmem %s1121_s30, 128 }
 0x347   :  { %v706_v1 = vadd.f32 %v681_v36, %v553_v59  ;;  %v738_v8 = vadd.f32 %v722_v46, %v705_v44  ;;  %1397 = vmatprep.subr.bf16.mxu1 %v1610_v20  ;;  %1393 = vmatprep.mubr.msk.bf16.mxu0 %vm1611_vm0, %v1610_v20  ;;  %v1456_v59 = vld [vmem:[#allocation11 + $0x18] sm:$0xff]   ;;  %p1572_p12 = scmp.ne.s32.totalorder %s1121_s30, %s1571_s5  ;;  %p1577_p0 = scmp.lt.s32.totalorder %s1571_s5, %s1571_s5 }
 0x348   :  { %v741_v25 = vadd.f32 %v725_v2, %v708_v17  ;;  %1398 = vmatpush3.bf16.msra.mxu1 %v1453_v55  ;;  %v1460_v44 = vld [vmem:[#allocation11 + $0x38] sm:$0xff]  }
 0x349   :  { %v739_v18 = vadd.f32 %v723_v37, %v706_v1  ;;  %1399 = vmatprep.subr.bf16.mxu1 %v1610_v20  ;;  %v1158_v37 = vld [vmem:[%s1980_s7] ss:$0 sm:$0xff]  ;;  %p1578_p1 = por %p1577_p0, %p1576_p13 }
 0x34a   :  { %v749_v19 = vpack.c.bf16 %v741_v25, %v740_v24 }
 0x34b   :  { %v748_v53 = vpack.c.bf16 %v739_v18, %v738_v8  ;;  %p1579_p2 = pnand %p1578_p1, %p1572_p12 }
 0x34c   :  { %1400 = vmatpush3.bf16.msra.mxu1 %v1454_v57 }
 0x34d   :  { %1373 = vmatprep.mubr.bf16.mxu1 %v748_v53  ;;  %1401 = vmatprep.subr.bf16.mxu1 %v1610_v20 }
 0x34e   :  { %1374 = vmatmul.mubr.bf16.gmra.mrb[28].mxu1 %v749_v19 }
 0x34f   :  { %1413 = vmatprep.mubr.msk.bf16.mxu1 %vm1611_vm0, %v1610_v20 }
 0x350   :  { %1402 = vmatpush3.bf16.msra.mxu1 %v1455_v58 }
 0x351   :  { %1403 = vmatprep.subr.bf16.mxu1 %v1610_v20 }
 0x354   :  { %1404 = vmatpush3.bf16.msra.mxu1 %v1456_v59 }
 0x355   :  { %1405 = vmatprep.subr.bf16.mxu1 %v1610_v20 }
 0x358   :  { %1406 = vmatpush3.bf16.msra.mxu1 %v1457_v6 }
 0x359   :  { %1407 = vmatprep.subr.bf16.mxu1 %v1610_v20 }
 0x35c   :  { %1408 = vmatpush3.bf16.msra.mxu1 %v1458_v4 }
 0x35d   :  { %1409 = vmatprep.subr.bf16.mxu1 %v1610_v20 }
 0x360   :  { %1410 = vmatpush3.bf16.msra.mxu1 %v1459_v16 }
 0x361   :  { %1411 = vmatprep.subr.bf16.mxu1 %v1610_v20 }
 0x364   :  { %1412 = vmatpush3.bf16.msra.mxu1 %v1460_v44 }
 0x409   :  { %v1363_v23 = vpop.f32.mrb[16].mxu1 }
 0x40a   :  { %v857_v39 = vpop.f32.mrb[17].mxu1  ;;  %v866_v9 = vadd.f32 %v1363_v23, %v1149_v27 }
 0x40b   :  { %v1364_v0 = vpop.f32.mrb[18].mxu1  ;;  %v858_v11 = vadd.f32 %v1149_v27, %v857_v39 }
 0x40c   :  { %v869_v40 = vadd.f32 %v1364_v0, %v1149_v27  ;;  %v860_v3 = vpop.f32.mrb[19].mxu1 }
 0x40d   :  { %v861_v41 = vadd.f32 %v1149_v27, %v860_v3 }
 0x40e   :  { %v954_v5 = vpack.c.bf16 %v869_v40, %v866_v9 }
 0x40f   :  { %v953_v12 = vpack.c.bf16 %v861_v41, %v858_v11 }
 0x411   :  { %v1367_v42 = vpop.f32.mrb[20].mxu1  ;;  %1378 = vmatpush3.bf16.msra.mxu0 %v953_v12 }
 0x412   :  { %v873_v43 = vpop.f32.mrb[21].mxu1  ;;  %1379 = vmatprep.subr.bf16.mxu0 %v1610_v20  ;;  %v882_v10 = vadd.f32 %v1367_v42, %v1149_v27 }
 0x413   :  { %v1368_v13 = vpop.f32.mrb[22].mxu1  ;;  %v874_v14 = vadd.f32 %v1149_v27, %v873_v43 }
 0x414   :  { %v885_v38 = vadd.f32 %v1368_v13, %v1149_v27  ;;  %v876_v50 = vpop.f32.mrb[23].mxu1 }
 0x415   :  { %v877_v51 = vadd.f32 %v1149_v27, %v876_v50  ;;  %1380 = vmatpush3.bf16.msra.mxu0 %v954_v5 }
 0x416   :  { %v956_v21 = vpack.c.bf16 %v885_v38, %v882_v10  ;;  %1381 = vmatprep.subr.bf16.mxu0 %v1610_v20 }
 0x417   :  { %v955_v29 = vpack.c.bf16 %v877_v51, %v874_v14 }
 0x419   :  { %v1371_v52 = vpop.f32.mrb[24].mxu1  ;;  %1382 = vmatpush3.bf16.msra.mxu0 %v955_v29 }
 0x41a   :  { %v889_v54 = vpop.f32.mrb[25].mxu1  ;;  %1383 = vmatprep.subr.bf16.mxu0 %v1610_v20  ;;  %v898_v26 = vadd.f32 %v1371_v52, %v1149_v27 }
 0x41b   :  { %v1372_v56 = vpop.f32.mrb[26].mxu1  ;;  %v890_v28 = vadd.f32 %v1149_v27, %v889_v54 }
 0x41c   :  { %v901_v7 = vadd.f32 %v1372_v56, %v1149_v27  ;;  %v892_v22 = vpop.f32.mrb[27].mxu1 }
 0x41d   :  { %v893_v30 = vadd.f32 %v1149_v27, %v892_v22  ;;  %1384 = vmatpush3.bf16.msra.mxu0 %v956_v21 }
 0x41e   :  { %v958_v60 = vpack.c.bf16 %v901_v7, %v898_v26  ;;  %1385 = vmatprep.subr.bf16.mxu0 %v1610_v20 }
 0x41f   :  { %v957_v61 = vpack.c.bf16 %v893_v30, %v890_v28 }
 0x421   :  { %v1375_v62 = vpop.f32.mrb[28].mxu1  ;;  %1386 = vmatpush3.bf16.msra.mxu0 %v957_v61 }
 0x422   :  { %v905_v45 = vpop.f32.mrb[29].mxu1  ;;  %1387 = vmatprep.subr.bf16.mxu0 %v1610_v20  ;;  %v914_v63 = vadd.f32 %v1375_v62, %v1149_v27 }
 0x423   :  { %v1376_v49 = vpop.f32.mrb[30].mxu1  ;;  %v906_v15 = vadd.f32 %v1149_v27, %v905_v45 }
 0x424   :  { %v917_v31 = vadd.f32 %v1376_v49, %v1149_v27  ;;  %v908_v32 = vpop.f32.mrb[31].mxu1 }
 0x425   :  { %v909_v47 = vadd.f32 %v1149_v27, %v908_v32  ;;  %1388 = vmatpush3.bf16.msra.mxu0 %v958_v60 }
 0x426   :  { %v960_v33 = vpack.c.bf16 %v917_v31, %v914_v63  ;;  %1389 = vmatprep.subr.bf16.mxu0 %v1610_v20 }
 0x427   :  { %v959_v34 = vpack.c.bf16 %v909_v47, %v906_v15 }
 0x429   :  { %1390 = vmatpush3.bf16.msra.mxu0 %v959_v34 }
 0x42a   :  { %1391 = vmatprep.subr.bf16.mxu0 %v1610_v20 }
 0x42d   :  { %1392 = vmatpush3.bf16.msra.mxu0 %v960_v33 }
 0x430   :  { %1394 = vmatmul.mubr.bf16.vlgmr.msra.gmra.mrb[32].mxu0 %v936_v35 }
 0x503   :  { %v995_v48 = vpop.f32.mrb[32].mxu0 }
 0x504   :  { %v1001_v2 = vpack.c.bf16 %v995_v48, %v995_v48  ;;  %v1395_v46 = vpop.f32.mrb[33].mxu0 }
 0x505   :  { %v998_v17 = vpop.f32.mrb[34].mxu0 }
 0x506   :  { %v1396_v36 = vpop.f32.mrb[35].mxu0  ;;  %1414 = vmatmul.mubr.bf16.vlgmr.msra.gmra.mrb[32].mxu1 %v1001_v2 }
 0x5d9   :  { %v1107_v1 = vpop.f32.mrb[32].mxu1 }
 0x5da   :  { %v1108_v24 = vadd.f32 %v1158_v37, %v1107_v1  ;;  %v1415_v25 = vpop.f32.mrb[33].mxu1 }
 0x5db   :  { %v1110_v8 = vpop.f32.mrb[34].mxu1 }
 0x5dc   :  { %1113 = vst [vmem:[#allocation12] sm:$0xff] %v1108_v24  ;;  %v1416_v18 = vpop.f32.mrb[35].mxu1 }
 0x5dd   :  { %1582 = shalt.err (!%p1579_p2)
}
 0x5de   :  { %s1583_s7 = scalar_lea.hbm %s1981_s8, 128 }
 0x5df   :  { %p1584_p3 = scmp.ne.s32.totalorder %s1981_s8, %s1583_s7  ;;  %p1587_p4 = scmp.lt.u32.totalorder %s1583_s7, %s1981_s8 }
 0x5e1   :  { %p1589_p5 = pnand %p1587_p4, %p1584_p3 }
 0x5e3   :  { %1592 = shalt.err (!%p1589_p5)
}
 0x5e4   :  { %1123 = dma.vmem_to_hbm [thread:$0]  %s1121_s30, 128, %s1981_s8, [#allocation5]  }
 0x5e5   :  { %1599 = dma.done.wait [#allocation5], 128  }
 0x5e6   :  { %1600 = vsyncadd [#allocation5], 4294967168 }
 0x5e7   :  { %1127 = vsyncpa [#allocation4], 1 }
 0x5e8   :  { %1128 = vsyncpa [#allocation7], 1 }
 0x5e9   :  { %1129 = vsyncpa [#allocation10], 1 }
 0x5ea   :  { %1130 = vsyncpa [#allocation5], 1 }

</bundles_post_ra>
